<compile_context>
chip_gen: v7x
topology: tpu7x:2x2x1
jax: 0.10.0
libtpu: 0.0.40
codegen_flags: <defaults>
</compile_context>

<pallas_src>
import functools

import jax
import jax.numpy as jnp
from jax import lax
from jax.experimental import pallas as pl
from jax.experimental.pallas import tpu as pltpu

_VMEM = pl.BlockSpec(memory_space=pltpu.MemorySpace.VMEM)
_BN_EPS = 1e-5
# Explicit scoped-VMEM budget: above v5e's 16 MiB default, safe on v7x (64 MiB
# physical per TC) and v6e (128 MiB physical).
_VMEM_LIMIT_BYTES = 32 * 1024 * 1024
# Sublane-aligned left halo used by the in-kernel padded scratch so the
# activation store into the scratch is always tile-aligned (requires pad <= 8).
_LPAD = 8


# ----------------------------- in-kernel math ------------------------------
def _erf(x):
    # Abramowitz & Stegun 7.1.26 polynomial erf, |abs err| <= 1.5e-7.
    # Kept (vs. tanh-approx GELU) so the f32 validation tolerance is exact;
    # the fused kernels are HBM-bound so the extra VALU work hides under DMA.
    a1, a2, a3, a4, a5 = 0.254829592, -0.284496736, 1.421413741, -1.453152027, 1.061405429
    p = 0.3275911
    ax = jnp.abs(x)
    t = 1.0 / (1.0 + p * ax)
    poly = ((((a5 * t + a4) * t + a3) * t + a2) * t + a1) * t
    y = 1.0 - poly * jnp.exp(-ax * ax)
    return jnp.where(x < 0.0, -y, y)


def _gelu(x):
    # exact (erf-based) GELU, matching torch.nn.GELU(approximate='none')
    return 0.5 * x * (1.0 + _erf(x * 0.7071067811865476))


def _pick_row_tile(m, cap=512):
    """Largest power-of-two row tile <= cap that divides m (else full m)."""
    for t in (512, 256, 128, 64, 32, 16, 8):
        if t <= cap and m % t == 0:
            return t
    return m


# ------------------------------ Pallas kernels ------------------------------
def _matmul_gelu_bn_kernel(x_ref, w_ref, b_ref, scale_ref, shift_ref, o_ref):
    """y = BN(GELU(x @ w + b)) for one row tile; used for the patchify conv."""
    y = jnp.dot(x_ref[...], w_ref[...], preferred_element_type=jnp.float32)
    y = _gelu(y + b_ref[...])
    o_ref[...] = y * scale_ref[...] + shift_ref[...]


def matmul_gelu_bn(x, w, b, scale, shift):
    m, kdim = x.shape
    n_out = w.shape[1]
    tm = _pick_row_tile(m)
    cost = pl.CostEstimate(
        flops=2 * m * kdim * n_out + 10 * m * n_out,
        transcendentals=m * n_out,
        bytes_accessed=4 * (m * kdim + kdim * n_out + 2 * m * n_out + 3 * n_out))
    return pl.pallas_call(
        _matmul_gelu_bn_kernel,
        out_shape=jax.ShapeDtypeStruct((m, n_out), jnp.float32),
        grid=(m // tm,),
        in_specs=[pl.BlockSpec((tm, kdim), lambda i: (i, 0)),
                  pl.BlockSpec((kdim, n_out), lambda i: (0, 0)),
                  pl.BlockSpec((1, n_out), lambda i: (0, 0)),
                  pl.BlockSpec((1, n_out), lambda i: (0, 0)),
                  pl.BlockSpec((1, n_out), lambda i: (0, 0))],
        out_specs=pl.BlockSpec((tm, n_out), lambda i: (i, 0)),
        compiler_params=pltpu.CompilerParams(
            dimension_semantics=("parallel",),
            vmem_limit_bytes=_VMEM_LIMIT_BYTES),
        cost_estimate=cost,
    )(x, w, b, scale, shift)


def _mixer_layer_kernel(x_ref, dww_ref, dwb_ref, s1_ref, t1_ref,
                        pww_ref, pwb_ref, s2_ref, t2_ref, o_ref, xpad_ref,
                        *, k, pad, lpad):
    """Fused mixer layer for one batch element (NHWC block):
       depthwise kxk 'same' conv -> GELU -> BN -> +residual
       -> 1x1 conv (matmul) -> GELU -> BN."""
    _, hh, ww, c = x_ref.shape
    x = x_ref[...]                                   # (1, H, W, C)

    # In-kernel 'same' padding: drop x into a zeroed VMEM scratch at a
    # sublane-aligned column offset (lpad % 8 == 0), so only the unpadded
    # activation ever crosses HBM<->VMEM.
    xpad_ref[...] = jnp.zeros(xpad_ref.shape, jnp.float32)
    xpad_ref[:, pad:pad + hh, lpad:lpad + ww, :] = x
    xp = xpad_ref[...]                               # resident padded tile

    # Depthwise conv: k*k shifted taps of the resident tile.
    acc = jnp.zeros((1, hh, ww, c), jnp.float32)
    for idx in range(k * k):
        dh, dw = idx // k, idx % k
        col0 = lpad - pad + dw
        tap = xp[:, dh:dh + hh, col0:col0 + ww, :]
        acc = acc + tap * dww_ref[idx:idx + 1, :]    # (1, C) broadcast

    y = _gelu(acc + dwb_ref[...])
    y = y * s1_ref[...] + t1_ref[...] + x            # BN + residual

    # Pointwise 1x1 conv == channel matmul on the VMEM-resident tile.
    y2 = jnp.dot(y.reshape(hh * ww, c), pww_ref[...],
                 preferred_element_type=jnp.float32)
    y2 = _gelu(y2 + pwb_ref[...])
    y2 = y2 * s2_ref[...] + t2_ref[...]
    o_ref[...] = y2.reshape(1, hh, ww, c)


def mixer_layer(x, dww, dwb, s1, t1, pww, pwb, s2, t2, *, k):
    n, hh, ww, c = x.shape
    pad = (k - 1) // 2
    assert pad <= _LPAD, "kernel_size too large for the aligned-halo scratch"
    kern = functools.partial(_mixer_layer_kernel, k=k, pad=pad, lpad=_LPAD)
    spec_act = pl.BlockSpec((1, hh, ww, c), lambda i: (i, 0, 0, 0))
    spec_vec = pl.BlockSpec((1, c), lambda i: (0, 0))
    cost = pl.CostEstimate(
        flops=n * hh * ww * c * (2 * k * k + 2 * c + 14),
        transcendentals=2 * n * hh * ww * c,
        bytes_accessed=4 * (2 * n * hh * ww * c + k * k * c + c * c + 6 * c))
    return pl.pallas_call(
        kern,
        out_shape=jax.ShapeDtypeStruct((n, hh, ww, c), jnp.float32),
        grid=(n,),
        in_specs=[spec_act,
                  pl.BlockSpec((k * k, c), lambda i: (0, 0)),
                  spec_vec, spec_vec, spec_vec,
                  pl.BlockSpec((c, c), lambda i: (0, 0)),
                  spec_vec, spec_vec, spec_vec],
        out_specs=spec_act,
        scratch_shapes=[pltpu.VMEM((1, hh + 2 * pad, _LPAD + ww + pad, c),
                                   jnp.float32)],
        compiler_params=pltpu.CompilerParams(
            dimension_semantics=("parallel",),
            vmem_limit_bytes=_VMEM_LIMIT_BYTES),
        cost_estimate=cost,
    )(x, dww, dwb, s1, t1, pww, pwb, s2, t2)


def _pool_linear_kernel(x_ref, w_ref, b_ref, logits_ref, emb_ref):
    """AdaptiveAvgPool2d((1,1)) + Flatten + Linear."""
    inv_hw = 1.0 / x_ref.shape[1]
    emb = jnp.sum(x_ref[...], axis=1) * inv_hw          # (N, C)
    emb_ref[...] = emb
    logits_ref[...] = (jnp.dot(emb, w_ref[...], preferred_element_type=jnp.float32)
                       + b_ref[...])


def pool_linear(x, w, b):
    n, hw, c = x.shape
    nc = w.shape[1]
    cost = pl.CostEstimate(
        flops=n * hw * c + 2 * n * c * nc,
        transcendentals=0,
        bytes_accessed=4 * (n * hw * c + c * nc + n * nc + n * c))
    return pl.pallas_call(
        _pool_linear_kernel,
        out_shape=(jax.ShapeDtypeStruct((n, nc), jnp.float32),
                   jax.ShapeDtypeStruct((n, c), jnp.float32)),
        in_specs=[_VMEM] * 3,
        out_specs=(_VMEM, _VMEM),
        compiler_params=pltpu.CompilerParams(vmem_limit_bytes=_VMEM_LIMIT_BYTES),
        cost_estimate=cost,
    )(x, w, b)


# --------------------------- parameters (glue) ------------------------------
def init_params(key, *, dim, depth, kernel_size, patch_size, num_classes):
    """Deterministic parameters in PyTorch layouts (OIHW conv weights etc.)."""
    keys = iter(jax.random.split(key, 8 + 12 * depth))

    def nrm(shape, s=0.1):
        return (s * jax.random.normal(next(keys), shape)).astype(jnp.float32)

    def unif(shape, lo, hi):
        return jax.random.uniform(next(keys), shape, jnp.float32, lo, hi)

    def bn(c):
        return dict(gamma=unif((c,), 0.8, 1.2), beta=nrm((c,)),
                    mean=nrm((c,)), var=unif((c,), 0.5, 1.5))

    params = dict(
        conv0_w=nrm((dim, 3, patch_size, patch_size), 0.2),
        conv0_b=nrm((dim,)),
        bn0=bn(dim),
        layers=[dict(
            dw_w=nrm((dim, 1, kernel_size, kernel_size), 0.2),
            dw_b=nrm((dim,)),
            bn1=bn(dim),
            pw_w=nrm((dim, dim, 1, 1), 0.2),
            pw_b=nrm((dim,)),
            bn2=bn(dim),
        ) for _ in range(depth)],
        lin_w=nrm((num_classes, dim), 0.2),
        lin_b=nrm((num_classes,)),
    )
    return params


def _fuse_bn(bn):
    scale = bn["gamma"] / jnp.sqrt(bn["var"] + _BN_EPS)
    shift = bn["beta"] - bn["mean"] * scale
    return scale.reshape(1, -1), shift.reshape(1, -1)


# ------------------------------ forward pass --------------------------------
def convmixer_forward(x_nchw, params, *, dim, depth, kernel_size, patch_size):
    n, cin, h_in, w_in = x_nchw.shape
    p = patch_size
    hp, wp = h_in // p, w_in // p

    # initial_conv (stride=patch) -> flatten each p x p x cin patch, matmul.
    patches = (x_nchw.reshape(n, cin, hp, p, wp, p)
               .transpose(0, 2, 4, 1, 3, 5)
               .reshape(n * hp * wp, cin * p * p))
    w0 = params["conv0_w"].reshape(dim, cin * p * p).T
    b0 = params["conv0_b"].reshape(1, dim)
    s0, t0 = _fuse_bn(params["bn0"])
    h = matmul_gelu_bn(patches, w0, b0, s0, t0).reshape(n, hp, wp, dim)

    # One fused pallas_call per mixer layer (dwconv+GELU+BN+res+1x1+GELU+BN).
    for layer in params["layers"]:
        wd = layer["dw_w"][:, 0].transpose(1, 2, 0).reshape(kernel_size * kernel_size, dim)
        bd = layer["dw_b"].reshape(1, dim)
        s1, t1 = _fuse_bn(layer["bn1"])
        wpw = layer["pw_w"].reshape(dim, dim).T
        bpw = layer["pw_b"].reshape(1, dim)
        s2, t2 = _fuse_bn(layer["bn2"])
        h = mixer_layer(h, wd, bd, s1, t1, wpw, bpw, s2, t2, k=kernel_size)

    wl = params["lin_w"].T
    bl = params["lin_b"].reshape(1, -1)
    logits, emb = pool_linear(h.reshape(n, hp * wp, dim), wl, bl)
    return logits, emb


# ---------------------- pure-JAX reference (validation) ---------------------
def reference_forward(x, params, *, dim, depth, kernel_size, patch_size):
    dn = ("NCHW", "OIHW", "NCHW")

    def gelu(v):
        return 0.5 * v * (1.0 + lax.erf(v * 0.7071067811865476))

    def bn(v, pp):
        inv = pp["gamma"] / jnp.sqrt(pp["var"] + _BN_EPS)
        return ((v - pp["mean"][None, :, None, None]) * inv[None, :, None, None]
                + pp["beta"][None, :, None, None])

    out = lax.conv_general_dilated(x, params["conv0_w"], (patch_size, patch_size),
                                   "VALID", dimension_numbers=dn)
    out = bn(gelu(out + params["conv0_b"][None, :, None, None]), params["bn0"])
    pad = (kernel_size - 1) // 2
    for layer in params["layers"]:
        h = lax.conv_general_dilated(out, layer["dw_w"], (1, 1),
                                     [(pad, pad), (pad, pad)],
                                     dimension_numbers=dn, feature_group_count=dim)
        h = bn(gelu(h + layer["dw_b"][None, :, None, None]), layer["bn1"]) + out
        h = lax.conv_general_dilated(h, layer["pw_w"], (1, 1), "VALID",
                                     dimension_numbers=dn)
        out = bn(gelu(h + layer["pw_b"][None, :, None, None]), layer["bn2"])
    emb = jnp.mean(out, axis=(2, 3))
    logits = emb @ params["lin_w"].T + params["lin_b"]
    return logits, emb


# ----------------------------------- main ------------------------------------
if __name__ == "__main__":
    dim, depth, kernel_size, patch_size, num_classes = 32, 2, 5, 2, 10
    key = jax.random.PRNGKey(0)
    kx, kp = jax.random.split(key)
    x = jax.random.normal(kx, (2, 3, 16, 16), jnp.float32)   # NCHW, like PyTorch
    params = init_params(kp, dim=dim, depth=depth, kernel_size=kernel_size,
                         patch_size=patch_size, num_classes=num_classes)

    logits, emb = convmixer_forward(x, params, dim=dim, depth=depth,
                                    kernel_size=kernel_size, patch_size=patch_size)
    jax.block_until_ready((logits, emb))

    ref_logits, ref_emb = reference_forward(x, params, dim=dim, depth=depth,
                                            kernel_size=kernel_size,
                                            patch_size=patch_size)
    assert logits.shape == (2, num_classes) and emb.shape == (2, dim)
    assert jnp.allclose(logits, ref_logits, atol=2e-3, rtol=2e-3)
    assert jnp.allclose(emb, ref_emb, atol=2e-3, rtol=2e-3)
    print("KERNEL_OK")
</pallas_src>

<mosaic_0001>
module attributes {stable_mosaic.version = 11 : i64} {
  func.func @_matmul_gelu_bn_kernel(%arg0: i32, %arg1: memref<128x12xf32, #tpu.memory_space<vmem>>, %arg2: memref<12x32xf32, #tpu.memory_space<vmem>>, %arg3: memref<1x32xf32, #tpu.memory_space<vmem>>, %arg4: memref<1x32xf32, #tpu.memory_space<vmem>>, %arg5: memref<1x32xf32, #tpu.memory_space<vmem>>, %arg6: memref<128x32xf32, #tpu.memory_space<vmem>>) attributes {dimension_semantics = [#tpu.dimension_semantics<parallel>], iteration_bounds = array<i64: 1>, scalar_prefetch = 0 : i64, scratch_operands = 0 : i64, tpu.core_type = #tpu.core_type<tc>, window_params = [{transform_indices = @transform_0, window_bounds = array<i64: 128, 12>}, {pipeline_mode = #tpu.pipeline_mode<synchronous>, transform_indices = @transform_1, window_bounds = array<i64: 12, 32>}, {pipeline_mode = #tpu.pipeline_mode<synchronous>, transform_indices = @transform_2, window_bounds = array<i64: 1, 32>}, {pipeline_mode = #tpu.pipeline_mode<synchronous>, transform_indices = @transform_3, window_bounds = array<i64: 1, 32>}, {pipeline_mode = #tpu.pipeline_mode<synchronous>, transform_indices = @transform_4, window_bounds = array<i64: 1, 32>}, {transform_indices = @transform_5, window_bounds = array<i64: 128, 32>}]} {
    %c0 = arith.constant 0 : index
    %c0_0 = arith.constant 0 : index
    %0 = vector.load %arg1[%c0, %c0_0] : memref<128x12xf32, #tpu.memory_space<vmem>>, vector<128x12xf32>
    %c0_1 = arith.constant 0 : index
    %c0_2 = arith.constant 0 : index
    %1 = vector.load %arg2[%c0_1, %c0_2] : memref<12x32xf32, #tpu.memory_space<vmem>>, vector<12x32xf32>
    %cst = arith.constant dense<0.000000e+00> : vector<128x32xf32>
    %2 = tpu.matmul %0, %1, %cst {dimension_numbers = #tpu.dot_dimension_numbers<[1], [0], [0], [1], [0, 0, 1, 1], [], []>} : vector<128x12xf32>, vector<12x32xf32>, vector<128x32xf32> -> vector<128x32xf32>
    %c0_3 = arith.constant 0 : index
    %c0_4 = arith.constant 0 : index
    %3 = vector.load %arg3[%c0_3, %c0_4] : memref<1x32xf32, #tpu.memory_space<vmem>>, vector<1x32xf32>
    %4 = vector.broadcast %3 : vector<1x32xf32> to vector<128x32xf32>
    %5 = arith.addf %2, %4 : vector<128x32xf32>
    %cst_5 = arith.constant 5.000000e-01 : f32
    %6 = vector.broadcast %cst_5 : f32 to vector<128x32xf32>
    %7 = arith.mulf %6, %5 : vector<128x32xf32>
    %cst_6 = arith.constant 0.707106769 : f32
    %8 = vector.broadcast %cst_6 : f32 to vector<128x32xf32>
    %9 = arith.mulf %5, %8 : vector<128x32xf32>
    %10 = math.absf %9 : vector<128x32xf32>
    %cst_7 = arith.constant 0.327591091 : f32
    %11 = vector.broadcast %cst_7 : f32 to vector<128x32xf32>
    %12 = arith.mulf %11, %10 : vector<128x32xf32>
    %cst_8 = arith.constant 1.000000e+00 : f32
    %13 = vector.broadcast %cst_8 : f32 to vector<128x32xf32>
    %14 = arith.addf %13, %12 : vector<128x32xf32>
    %cst_9 = arith.constant 1.000000e+00 : f32
    %15 = vector.broadcast %cst_9 : f32 to vector<128x32xf32>
    %16 = arith.divf %15, %14 : vector<128x32xf32>
    %cst_10 = arith.constant 1.06140542 : f32
    %17 = vector.broadcast %cst_10 : f32 to vector<128x32xf32>
    %18 = arith.mulf %17, %16 : vector<128x32xf32>
    %cst_11 = arith.constant -1.45315206 : f32
    %19 = vector.broadcast %cst_11 : f32 to vector<128x32xf32>
    %20 = arith.addf %18, %19 : vector<128x32xf32>
    %21 = arith.mulf %20, %16 : vector<128x32xf32>
    %cst_12 = arith.constant 1.42141378 : f32
    %22 = vector.broadcast %cst_12 : f32 to vector<128x32xf32>
    %23 = arith.addf %21, %22 : vector<128x32xf32>
    %24 = arith.mulf %23, %16 : vector<128x32xf32>
    %cst_13 = arith.constant -0.284496725 : f32
    %25 = vector.broadcast %cst_13 : f32 to vector<128x32xf32>
    %26 = arith.addf %24, %25 : vector<128x32xf32>
    %27 = arith.mulf %26, %16 : vector<128x32xf32>
    %cst_14 = arith.constant 0.254829586 : f32
    %28 = vector.broadcast %cst_14 : f32 to vector<128x32xf32>
    %29 = arith.addf %27, %28 : vector<128x32xf32>
    %30 = arith.mulf %29, %16 : vector<128x32xf32>
    %cst_15 = arith.constant 0.000000e+00 : f32
    %31 = vector.broadcast %cst_15 : f32 to vector<128x32xf32>
    %32 = arith.subf %31, %10 : vector<128x32xf32>
    %33 = arith.mulf %32, %10 : vector<128x32xf32>
    %34 = math.exp %33 : vector<128x32xf32>
    %35 = arith.mulf %30, %34 : vector<128x32xf32>
    %cst_16 = arith.constant 1.000000e+00 : f32
    %36 = vector.broadcast %cst_16 : f32 to vector<128x32xf32>
    %37 = arith.subf %36, %35 : vector<128x32xf32>
    %cst_17 = arith.constant 0.000000e+00 : f32
    %38 = vector.broadcast %cst_17 : f32 to vector<128x32xf32>
    %39 = arith.cmpf olt, %9, %38 : vector<128x32xf32>
    %cst_18 = arith.constant 0.000000e+00 : f32
    %40 = vector.broadcast %cst_18 : f32 to vector<128x32xf32>
    %41 = arith.subf %40, %37 : vector<128x32xf32>
    %42 = arith.select %39, %41, %37 : vector<128x32xi1>, vector<128x32xf32>
    %cst_19 = arith.constant 1.000000e+00 : f32
    %43 = vector.broadcast %cst_19 : f32 to vector<128x32xf32>
    %44 = arith.addf %43, %42 : vector<128x32xf32>
    %45 = arith.mulf %7, %44 : vector<128x32xf32>
    %c0_20 = arith.constant 0 : index
    %c0_21 = arith.constant 0 : index
    %46 = vector.load %arg4[%c0_20, %c0_21] : memref<1x32xf32, #tpu.memory_space<vmem>>, vector<1x32xf32>
    %47 = vector.broadcast %46 : vector<1x32xf32> to vector<128x32xf32>
    %48 = arith.mulf %45, %47 : vector<128x32xf32>
    %c0_22 = arith.constant 0 : index
    %c0_23 = arith.constant 0 : index
    %49 = vector.load %arg5[%c0_22, %c0_23] : memref<1x32xf32, #tpu.memory_space<vmem>>, vector<1x32xf32>
    %50 = vector.broadcast %49 : vector<1x32xf32> to vector<128x32xf32>
    %51 = arith.addf %48, %50 : vector<128x32xf32>
    %c0_24 = arith.constant 0 : index
    %c0_25 = arith.constant 0 : index
    %52 = vector.load %arg6[%c0_24, %c0_25] : memref<128x32xf32, #tpu.memory_space<vmem>>, vector<128x32xf32>
    tpu.vector_store %arg6[%c0_24, %c0_25], %51 {strides = array<i32>} : memref<128x32xf32, #tpu.memory_space<vmem>>, vector<128x32xf32>,
    return
  }
  func.func @transform_0(%arg0: i32) -> (i32, i32) {
    %c0_i32 = arith.constant 0 : i32
    %c0_i32_0 = arith.constant 0 : i32
    return %arg0, %c0_i32 : i32, i32
  }
  func.func @transform_1(%arg0: i32) -> (i32, i32) {
    %c0_i32 = arith.constant 0 : i32
    %c0_i32_0 = arith.constant 0 : i32
    %c0_i32_1 = arith.constant 0 : i32
    return %c0_i32, %c0_i32_0 : i32, i32
  }
  func.func @transform_2(%arg0: i32) -> (i32, i32) {
    %c0_i32 = arith.constant 0 : i32
    %c0_i32_0 = arith.constant 0 : i32
    %c0_i32_1 = arith.constant 0 : i32
    return %c0_i32, %c0_i32_0 : i32, i32
  }
  func.func @transform_3(%arg0: i32) -> (i32, i32) {
    %c0_i32 = arith.constant 0 : i32
    %c0_i32_0 = arith.constant 0 : i32
    %c0_i32_1 = arith.constant 0 : i32
    return %c0_i32, %c0_i32_0 : i32, i32
  }
  func.func @transform_4(%arg0: i32) -> (i32, i32) {
    %c0_i32 = arith.constant 0 : i32
    %c0_i32_0 = arith.constant 0 : i32
    %c0_i32_1 = arith.constant 0 : i32
    return %c0_i32, %c0_i32_0 : i32, i32
  }
  func.func @transform_5(%arg0: i32) -> (i32, i32) {
    %c0_i32 = arith.constant 0 : i32
    %c0_i32_0 = arith.constant 0 : i32
    return %arg0, %c0_i32 : i32, i32
  }
}

</mosaic_0001>

<bundles_post_ra>
// kernel: tpu_custom_call.1
= control target key start
LH: loop header
LB: loop body
LE: loop exit
PB: predicated region body
PF: predicated region fallthrough
CT: control target
= control target key end

     0   :  { %vm94_vm0 = vcmask 1043456   ;;  %vm45_vm1 = vcmask 97280   ;;  %vm881_vm2 = vmmov 1   ;;  %vm721_vm8 = vcmask 261120   ;;  %s1417_s1 = inlined_call_operand.vmem [shape: f32[12,32], index: 1, kind: input, shape index: {}]   ;;  %s1418_s0 = inlined_call_operand.vmem [shape: f32[128,12], index: 0, kind: input, shape index: {}]   ;;  %s1419_s2 = inlined_call_operand.vmem [shape: f32[1,32], index: 2, kind: input, shape index: {}]   ;;  %s1420_s3 = inlined_call_operand.vmem [shape: f32[1,32], index: 3, kind: input, shape index: {}]   ;;  %s1421_s4 = inlined_call_operand.vmem [shape: f32[1,32], index: 4, kind: input, shape index: {}]   ;;  %s1422_s5 = inlined_call_operand.vmem [shape: f32[128,32], index: 5, kind: output, shape index: {}]  }
   0x1   :  { %v36_v0 = vld [vmem:[%s1417_s1] sm:$0xff]  ;;  %v37_v1 = vld [vmem:[%s1417_s1 + $0x8] sm:$0xf]  ;;  %vm809_vm3 = vmpackc.low %vm94_vm0, %vm881_vm2 }
   0x2   :  { %v808_v2 = vpack.c.bf16 %v37_v1, %v36_v0  ;;  %v20_v3 = vld [vmem:[%s1418_s0] sm:$0xff]  ;;  %v21_v5 = vld [vmem:[%s1418_s0 + $0x8] sm:$0xff]  ;;  %v22_v7 = vld [vmem:[%s1418_s0 + $0x10] sm:$0xff] }
   0x3   :  { %v28_v4 = vld [vmem:[%s1418_s0 + $0x40] sm:$0xff]  ;;  %784 = vmatprep.mubr.msk.f32.mxu0 %vm45_vm1, %v20_v3  ;;  %v29_v6 = vld [vmem:[%s1418_s0 + $0x48] sm:$0xff]  ;;  %v30_v8 = vld [vmem:[%s1418_s0 + $0x50] sm:$0xff] }
   0x4   :  { %796 = vmatprep.mubr.msk.f32.mxu1 %vm45_vm1, %v28_v4  ;;  %810 = vmatprep.subr.msk.bf16.mxu0 %vm809_vm3, %v808_v2  ;;  %v23_v9 = vld [vmem:[%s1418_s0 + $0x18] sm:$0xff]  ;;  %v24_v11 = vld [vmem:[%s1418_s0 + $0x20] sm:$0xff]  ;;  %v25_v13 = vld [vmem:[%s1418_s0 + $0x28] sm:$0xff] }
   0x5   :  { %814 = vmatprep.subr.msk.bf16.mxu1 %vm809_vm3, %v808_v2  ;;  %813 = vmatpush3.bf16.msk.msra.mxu0 %vm809_vm3, %v808_v2  ;;  %v31_v10 = vld [vmem:[%s1418_s0 + $0x58] sm:$0xff]  ;;  %v32_v12 = vld [vmem:[%s1418_s0 + $0x60] sm:$0xff]  ;;  %v33_v14 = vld [vmem:[%s1418_s0 + $0x68] sm:$0xff] }
   0x6   :  { %815 = vmatpush3.bf16.msk.msra.mxu1 %vm809_vm3, %v808_v2  ;;  %v26_v15 = vld [vmem:[%s1418_s0 + $0x30] sm:$0xff]  ;;  %v27_v17 = vld [vmem:[%s1418_s0 + $0x38] sm:$0xff]  ;;  %v985_v19 = vld [vmem:[%s1419_s2] ss:$0 sm:$0xff] }
   0x7   :  { %v34_v16 = vld [vmem:[%s1418_s0 + $0x70] sm:$0xff]  ;;  %v35_v18 = vld [vmem:[%s1418_s0 + $0x78] sm:$0xff] }
   0x8   :  { %785 = vmatmul.mubr.msk.f32.vlgmr.msra.gmra.mrb[0].mxu0 %vm45_vm1, %v21_v5 }
   0x9   :  { %797 = vmatmul.mubr.msk.f32.vlgmr.msra.gmra.mrb[0].mxu1 %vm45_vm1, %v29_v6  ;;  %787 = vmatprep.mubr.msk.f32.mxu0 %vm45_vm1, %v22_v7 }
   0xa   :  { %799 = vmatprep.mubr.msk.f32.mxu1 %vm45_vm1, %v30_v8 }
   0xc   :  { %788 = vmatmul.mubr.msk.f32.gmra.mrb[2].mxu0 %vm45_vm1, %v23_v9 }
   0xd   :  { %800 = vmatmul.mubr.msk.f32.gmra.mrb[2].mxu1 %vm45_vm1, %v31_v10  ;;  %790 = vmatprep.mubr.msk.f32.mxu0 %vm45_vm1, %v24_v11 }
   0xe   :  { %802 = vmatprep.mubr.msk.f32.mxu1 %vm45_vm1, %v32_v12 }
  0x10   :  { %791 = vmatmul.mubr.msk.f32.gmra.mrb[4].mxu0 %vm45_vm1, %v25_v13 }
  0x11   :  { %803 = vmatmul.mubr.msk.f32.gmra.mrb[4].mxu1 %vm45_vm1, %v33_v14  ;;  %793 = vmatprep.mubr.msk.f32.mxu0 %vm45_vm1, %v26_v15 }
  0x12   :  { %805 = vmatprep.mubr.msk.f32.mxu1 %vm45_vm1, %v34_v16 }
  0x14   :  { %794 = vmatmul.mubr.msk.f32.gmra.mrb[6].mxu0 %vm45_vm1, %v27_v17 }
  0x15   :  { %806 = vmatmul.mubr.msk.f32.gmra.mrb[6].mxu1 %vm45_vm1, %v35_v18 }
  0xdb   :  { %v786_v20 = vpop.f32.mrb[0].mxu0 }
  0xdc   :  { %v798_v21 = vpop.f32.mrb[0].mxu1  ;;  %v170_v22 = vadd.f32 %v786_v20, %v985_v19  ;;  %v164_v24 = vpop.f32.mrb[1].mxu0 }
  0xdd   :  { %v210_v23 = vadd.f32 %v798_v21, %v985_v19  ;;  %v204_v25 = vpop.f32.mrb[1].mxu1  ;;  %v165_v26 = vadd.f32 %v985_v19, %v164_v24 }
  0xde   :  { %v205_v27 = vadd.f32 %v985_v19, %v204_v25  ;;  %v991_v28 = vmul.f32 0.70710677, %v170_v22  ;;  %v1003_v48 = vmul.f32 0.5, %v170_v22 }
  0xdf   :  { %v993_v29 = vmul.f32 0.70710677, %v210_v23  ;;  %v995_v30 = vmul.f32 0.70710677, %v165_v26  ;;  %v789_v46 = vpop.f32.mrb[2].mxu0  ;;  %v1005_v50 = vmul.f32 0.5, %v210_v23 }
  0xe0   :  { %v997_v31 = vmul.f32 0.70710677, %v205_v27  ;;  %v276_v32 = vand.u32 2147483647, %v991_v28  ;;  %v801_v47 = vpop.f32.mrb[2].mxu1  ;;  %v174_v51 = vpop.f32.mrb[3].mxu0  ;;  %v180_v55 = vadd.f32 %v789_v46, %v985_v19 }
  0xe1   :  { %v284_v33 = vand.u32 2147483647, %v993_v29  ;;  %v275_v34 = vand.u32 2147483647, %v995_v30  ;;  %v214_v52 = vpop.f32.mrb[3].mxu1  ;;  %v1010_v58 = vmul.f32 0.5, %v165_v26  ;;  %v220_v60 = vadd.f32 %v801_v47, %v985_v19 }
  0xe2   :  { %v283_v35 = vand.u32 2147483647, %v997_v31  ;;  %v292_v36 = vmul.f32 0.3275911, %v276_v32  ;;  %v500_v37 = vsub.f32 0.0, %v276_v32  ;;  %v1020_v2 = vadd.f32 %v985_v19, %v174_v51 }
  0xe3   :  { %v300_v38 = vmul.f32 0.3275911, %v284_v33  ;;  %v508_v39 = vsub.f32 0.0, %v284_v33  ;;  %v291_v40 = vmul.f32 0.3275911, %v275_v34  ;;  %v499_v41 = vsub.f32 0.0, %v275_v34 }
  0xe4   :  { %v299_v42 = vmul.f32 0.3275911, %v283_v35  ;;  %v308_v43 = vadd.f32 1.0, %v292_v36  ;;  %v507_v45 = vsub.f32 0.0, %v283_v35  ;;  %v516_v49 = vmul.f32 %v500_v37, %v276_v32  ;;  %v792_v56 = vpop.f32.mrb[4].mxu0  ;;  %v1008_v57 = vpop.f32.mrb[4].mxu1 }
  0xe5   :  { %v316_v44 = vadd.f32 1.0, %v300_v38  ;;  %v524_v53 = vmul.f32 %v508_v39, %v284_v33  ;;  %v307_v54 = vadd.f32 1.0, %v291_v40  ;;  %v515_v59 = vmul.f32 %v499_v41, %v275_v34  ;;  %v1013_v61 = vpop.f32.mrb[5].mxu0  ;;  %v1015_v62 = vpop.f32.mrb[5].mxu1 }
  0xe6   :  { %817 = vrcp.f32 %v308_v43  ;;  %v315_v63 = vadd.f32 1.0, %v299_v42  ;;  %v523_v0 = vmul.f32 %v507_v45, %v283_v35  ;;  %v1017_v1 = vmul.f32 0.70710677, %v180_v55 }
  0xe7   :  { %819 = vrcp.f32 %v316_v44  ;;  %v1022_v3 = vpop.f32.mrb[6].mxu0  ;;  %v533_v5 = vmul.f32 1.442695, %v516_v49  ;;  %v1026_v6 = vmul.f32 0.70710677, %v220_v60  ;;  %v1034_v11 = vadd.f32 %v985_v19, %v214_v52 }
  0xe8   :  { %v1024_v4 = vpop.f32.mrb[6].mxu1  ;;  %v1028_v7 = vpop.f32.mrb[7].mxu0  ;;  %v549_v9 = vmul.f32 1.442695, %v524_v53  ;;  %821 = vrcp.f32 %v307_v54  ;;  %v278_v10 = vand.u32 2147483647, %v1017_v1  ;;  %v1058_v47 = vadd.f32 %v792_v56, %v985_v19 }
  0xe9   :  { %v1030_v8 = vpop.f32.mrb[7].mxu1  ;;  %v531_v12 = vmul.f32 1.442695, %v515_v59  ;;  %v286_v13 = vand.u32 2147483647, %v1026_v6  ;;  %823 = vrcp.f32 %v315_v63  ;;  %v1040_v18 = vmul.f32 0.5, %v205_v27 }
  0xea   :  { %v1038_v14 = vmul.f32 0.70710677, %v1020_v2  ;;  %v547_v15 = vmul.f32 1.442695, %v523_v0  ;;  %v294_v16 = vmul.f32 0.3275911, %v278_v10  ;;  %825 = vpow2.f32 %v533_v5 }
  0xeb   :  { %v502_v17 = vsub.f32 0.0, %v278_v10  ;;  %v302_v20 = vmul.f32 0.3275911, %v286_v13  ;;  %v510_v21 = vsub.f32 0.0, %v286_v13  ;;  %v1044_v25 = vmul.f32 0.70710677, %v1034_v11 }
  0xec   :  { %v277_v22 = vand.u32 2147483647, %v1038_v14  ;;  %v310_v23 = vadd.f32 1.0, %v294_v16  ;;  %827 = vpow2.f32 %v549_v9  ;;  %v1048_v35 = vmul.f32 0.5, %v180_v55 }
  0xed   :  { %v518_v24 = vmul.f32 %v502_v17, %v278_v10  ;;  %v318_v26 = vadd.f32 1.0, %v302_v20  ;;  %v526_v27 = vmul.f32 %v510_v21, %v286_v13  ;;  %v285_v36 = vand.u32 2147483647, %v1044_v25 }
  0xee   :  { %v293_v32 = vmul.f32 0.3275911, %v277_v22  ;;  %v501_v33 = vsub.f32 0.0, %v277_v22  ;;  %829 = vrcp.f32 %v310_v23  ;;  %v1054_v39 = vmul.f32 0.5, %v220_v60 }
  0xef   :  { %831 = vrcp.f32 %v318_v26  ;;  %v537_v42 = vmul.f32 1.442695, %v518_v24  ;;  %v301_v44 = vmul.f32 0.3275911, %v285_v36  ;;  %v509_v46 = vsub.f32 0.0, %v285_v36 }
  0xf0   :  { %v1046_v34 = vpop.eup %817  ;;  %v309_v40 = vadd.f32 1.0, %v293_v32  ;;  %v517_v43 = vmul.f32 %v501_v33, %v277_v22  ;;  %833 = vpow2.f32 %v531_v12  ;;  %v553_v52 = vmul.f32 1.442695, %v526_v27 }
  0xf1   :  { %v1051_v37 = vpop.eup %819  ;;  %v356_v38 = vmul.f32 1.0614054, %v1046_v34  ;;  %v317_v53 = vadd.f32 1.0, %v301_v44  ;;  %v525_v0 = vmul.f32 %v509_v46, %v285_v36  ;;  %v1068_v56 = vmul.f32 0.70710677, %v1058_v47 }
  0xf2   :  { %v364_v41 = vmul.f32 1.0614054, %v1051_v37  ;;  %v1060_v49 = vpop.eup %821  ;;  %835 = vrcp.f32 %v309_v40  ;;  %v535_v59 = vmul.f32 1.442695, %v517_v43  ;;  %v1087_v44 = vadd.f32 %v1008_v57, %v985_v19 }
  0xf3   :  { %v372_v45 = vadd.f32 -1.4531521, %v356_v38  ;;  %v355_v55 = vmul.f32 1.0614054, %v1060_v49  ;;  %837 = vpow2.f32 %v547_v15  ;;  %v1064_v60 = vpop.eup %823  ;;  %v1072_v15 = vmul.f32 0.5, %v1020_v2 }
  0xf4   :  { %v380_v51 = vadd.f32 -1.4531521, %v364_v41  ;;  %839 = vpow2.f32 %v537_v42  ;;  %v363_v10 = vmul.f32 1.0614054, %v1064_v60  ;;  %v826_v12 = vpop.eup %825  ;;  %v280_v16 = vand.u32 2147483647, %v1068_v56 }
  0xf5   :  { %v388_v54 = vmul.f32 %v1046_v34, %v372_v45  ;;  %v371_v9 = vadd.f32 -1.4531521, %v355_v55  ;;  %841 = vrcp.f32 %v317_v53  ;;  %v551_v26 = vmul.f32 1.442695, %v525_v0 }
  0xf6   :  { %v396_v63 = vmul.f32 %v1051_v37, %v380_v51  ;;  %843 = vpow2.f32 %v553_v52  ;;  %v828_v17 = vpop.eup %827  ;;  %v379_v22 = vadd.f32 -1.4531521, %v363_v10  ;;  %v296_v32 = vmul.f32 0.3275911, %v280_v16 }
  0xf7   :  { %v404_v5 = vadd.f32 1.4214138, %v388_v54  ;;  %v387_v21 = vmul.f32 %v1060_v49, %v371_v9  ;;  %845 = vpow2.f32 %v535_v59  ;;  %v504_v33 = vsub.f32 0.0, %v280_v16 }
  0xf8   :  { %v412_v13 = vadd.f32 1.4214138, %v396_v63  ;;  %v1077_v23 = vpop.eup %829  ;;  %v395_v38 = vmul.f32 %v1064_v60, %v379_v22  ;;  %v312_v43 = vadd.f32 1.0, %v296_v32  ;;  %847 = vpow2.f32 %v551_v26 }
  0xf9   :  { %v420_v20 = vmul.f32 %v1046_v34, %v404_v5  ;;  %v1080_v27 = vpop.eup %831  ;;  %v403_v36 = vadd.f32 1.4214138, %v387_v21  ;;  %v358_v40 = vmul.f32 1.0614054, %v1077_v23  ;;  %v1094_v63 = vmul.f32 %v504_v33, %v280_v16 }
  0xfa   :  { %v428_v24 = vmul.f32 %v1051_v37, %v412_v13  ;;  %v366_v42 = vmul.f32 1.0614054, %v1080_v27  ;;  %v834_v45 = vpop.eup %833  ;;  %v411_v52 = vadd.f32 1.4214138, %v395_v38  ;;  %vm596_vm4 = vcmp.lt.f32.partialorder %v991_v28, 0.0 }
  0xfb   :  { %v436_v2 = vadd.f32 -0.28449672, %v420_v20  ;;  %v419_v51 = vmul.f32 %v1060_v49, %v403_v36  ;;  %v374_v53 = vadd.f32 -1.4531521, %v358_v40  ;;  %849 = vrcp.f32 %v312_v43 }
  0xfc   :  { %v444_v41 = vadd.f32 -0.28449672, %v428_v24  ;;  %v1091_v54 = vpop.eup %835  ;;  %v382_v59 = vadd.f32 -1.4531521, %v366_v42  ;;  %v427_v57 = vmul.f32 %v1064_v60, %v411_v52  ;;  %vm604_vm5 = vcmp.lt.f32.partialorder %v993_v29, 0.0 }
  0xfd   :  { %v452_v46 = vmul.f32 %v1046_v34, %v436_v2  ;;  %v838_v0 = vpop.eup %837  ;;  %v435_v9 = vadd.f32 -0.28449672, %v419_v51  ;;  %v390_v10 = vmul.f32 %v1077_v23, %v374_v53  ;;  %v357_v22 = vmul.f32 1.0614054, %v1091_v54 }
  0xfe   :  { %v460_v55 = vmul.f32 %v1051_v37, %v444_v41  ;;  %v1098_v13 = vpop.eup %839  ;;  %v398_v21 = vmul.f32 %v1080_v27, %v382_v59  ;;  %v443_v32 = vadd.f32 -0.28449672, %v427_v57  ;;  %vm595_vm6 = vcmp.lt.f32.partialorder %v995_v30, 0.0 }
  0xff   :  { %v468_v5 = vadd.f32 0.2548296, %v452_v46  ;;  %v1103_v24 = vpop.eup %841  ;;  %v451_v26 = vmul.f32 %v1060_v49, %v435_v9  ;;  %v406_v33 = vadd.f32 1.4214138, %v390_v10  ;;  %v373_v40 = vadd.f32 -1.4531521, %v357_v22 }
 0x100   :  { %v476_v20 = vadd.f32 0.2548296, %v460_v55  ;;  %v1108_v2 = vpop.eup %843  ;;  %v414_v38 = vadd.f32 1.4214138, %v398_v21  ;;  %v365_v41 = vmul.f32 1.0614054, %v1103_v24 }
 0x101   :  { %v484_v16 = vmul.f32 %v1046_v34, %v468_v5  ;;  %v1112_v42 = vpop.eup %845  ;;  %v467_v46 = vadd.f32 0.2548296, %v451_v26  ;;  %v459_v34 = vmul.f32 %v1064_v60, %v443_v32  ;;  %v422_v51 = vmul.f32 %v1077_v23, %v406_v33 }
 0x102   :  { %v492_v36 = vmul.f32 %v1051_v37, %v476_v20  ;;  %v430_v53 = vmul.f32 %v1080_v27, %v414_v38  ;;  %v389_v55 = vmul.f32 %v1091_v54, %v373_v40  ;;  %v381_v37 = vadd.f32 -1.4531521, %v365_v41  ;;  %v1124_v32 = vpop.eup %847 }
 0x103   :  { %v564_v43 = vmul.f32 %v826_v12, %v484_v16  ;;  %v483_v5 = vmul.f32 %v1060_v49, %v467_v46  ;;  %v475_v9 = vadd.f32 0.2548296, %v459_v34  ;;  %v438_v57 = vadd.f32 -0.28449672, %v422_v51 }
 0x104   :  { %v572_v52 = vmul.f32 %v828_v17, %v492_v36  ;;  %vm603_vm7 = vcmp.lt.f32.partialorder %v997_v31, 0.0  ;;  %v446_v12 = vadd.f32 -0.28449672, %v430_v53  ;;  %v405_v20 = vadd.f32 1.4214138, %v389_v55 }
 0x105   :  { %v580_v59 = vsub.f32 1.0, %v564_v43  ;;  %v397_v21 = vmul.f32 %v1103_v24, %v381_v37  ;;  %v563_v22 = vmul.f32 %v834_v45, %v483_v5  ;;  %v491_v16 = vmul.f32 %v1064_v60, %v475_v9  ;;  %v1130_v34 = vpop.eup %849  ;;  %v1138_v53 = vld [vmem:[%s1420_s3] ss:$0 sm:$0xff] }
 0x106   :  { %v588_v10 = vsub.f32 1.0, %v572_v52  ;;  %v454_v26 = vmul.f32 %v1077_v23, %v438_v57  ;;  %v462_v49 = vmul.f32 %v1080_v27, %v446_v12  ;;  %v421_v36 = vmul.f32 %v1091_v54, %v405_v20  ;;  %v1149_v57 = vld [vmem:[%s1421_s4] ss:$0 sm:$0xff] }
 0x107   :  { %v612_v17 = vsub.f32 0.0, %v580_v59  ;;  %v413_v38 = vadd.f32 1.4214138, %v397_v21  ;;  %v579_v41 = vsub.f32 1.0, %v563_v22  ;;  %v571_v43 = vmul.f32 %v838_v0, %v491_v16 }
 0x108   :  { %v620_v33 = vsub.f32 0.0, %v588_v10  ;;  %v470_v46 = vadd.f32 0.2548296, %v454_v26  ;;  %vm598_vm9 = vcmp.lt.f32.partialorder %v1017_v1, 0.0  ;;  %v478_v51 = vadd.f32 0.2548296, %v462_v49 }
 0x109   :  { %v628_v40 = vsel %vm596_vm4, %v612_v17, %v580_v59  ;;  %v437_v52 = vadd.f32 -0.28449672, %v421_v36  ;;  %v611_v55 = vsub.f32 0.0, %v579_v41  ;;  %v587_v37 = vsub.f32 1.0, %v571_v43 }
 0x10a   :  { %v644_v45 = vadd.f32 1.0, %v628_v40  ;;  %v636_v60 = vsel %vm604_vm5, %v620_v33, %v588_v10  ;;  %v486_v0 = vmul.f32 %v1077_v23, %v470_v46  ;;  %vm606_vm10 = vcmp.lt.f32.partialorder %v1026_v6, 0.0 }
 0x10b   :  { %v652_v28 = vadd.f32 1.0, %v636_v60  ;;  %v494_v29 = vmul.f32 %v1080_v27, %v478_v51  ;;  %v453_v5 = vmul.f32 %v1091_v54, %v437_v52  ;;  %v429_v9 = vmul.f32 %v1103_v24, %v413_v38 }
 0x10c   :  { %v660_v59 = vmul.f32 %v644_v45, %v1003_v48  ;;  %v627_v23 = vsel %vm595_vm6, %v611_v55, %v579_v41  ;;  %v619_v12 = vsub.f32 0.0, %v587_v37  ;;  %v566_v20 = vmul.f32 %v1098_v13, %v486_v0 }
 0x10d   :  { %v668_v10 = vmul.f32 %v652_v28, %v1005_v50  ;;  %v643_v27 = vadd.f32 1.0, %v627_v23  ;;  %v574_v21 = vmul.f32 %v1108_v2, %v494_v29  ;;  %v469_v17 = vadd.f32 0.2548296, %v453_v5 }
 0x10e   :  { %v683_v48 = vmul.f32 %v1138_v53, %v660_v59  ;;  %v635_v16 = vsel %vm603_vm7, %v619_v12, %v587_v37  ;;  %v582_v26 = vsub.f32 1.0, %v566_v20  ;;  %v445_v33 = vadd.f32 -0.28449672, %v429_v9 }
 0x10f   :  { %v691_v22 = vmul.f32 %v1138_v53, %v668_v10  ;;  %v659_v30 = vmul.f32 %v643_v27, %v1010_v58  ;;  %v651_v49 = vadd.f32 1.0, %v635_v16  ;;  %v590_v36 = vsub.f32 1.0, %v574_v21 }
 0x110   :  { %v706_v50 = vadd.f32 %v1149_v57, %v683_v48  ;;  %v614_v38 = vsub.f32 0.0, %v582_v26  ;;  %v485_v40 = vmul.f32 %v1091_v54, %v469_v17  ;;  %v461_v2 = vmul.f32 %v1103_v24, %v445_v33 }
 0x111   :  { %v714_v13 = vadd.f32 %v1149_v57, %v691_v22  ;;  %v682_v31 = vmul.f32 %v1138_v53, %v659_v30  ;;  %v667_v41 = vmul.f32 %v651_v49, %v1040_v18  ;;  %v622_v43 = vsub.f32 0.0, %v590_v36 }
 0x112   :  { %723 = vst.msk [vmem:[%s1422_s5 + $0x8] sm:$0xff] %vm721_vm8, %v706_v50  ;;  %v360_v58 = vmul.f32 1.0614054, %v1130_v34  ;;  %v630_v54 = vsel %vm598_vm9, %v614_v38, %v582_v26  ;;  %v565_v46 = vmul.f32 %v1112_v42, %v485_v40  ;;  %v477_v45 = vadd.f32 0.2548296, %v461_v2 }
 0x113   :  { %731 = vst.msk [vmem:[%s1422_s5 + $0x48] sm:$0xff] %vm721_vm8, %v714_v13  ;;  %v1181_v60 = vadd.f32 %v985_v19, %v1013_v61  ;;  %v705_v18 = vadd.f32 %v1149_v57, %v682_v31  ;;  %v690_v51 = vmul.f32 %v1138_v53, %v667_v41  ;;  %v646_v52 = vadd.f32 1.0, %v630_v54 }
 0x114   :  { %v638_v28 = vsel %vm606_vm10, %v622_v43, %v590_v36  ;;  %v581_v37 = vsub.f32 1.0, %v565_v46  ;;  %v493_v1 = vmul.f32 %v1103_v24, %v477_v45  ;;  %v376_v0 = vadd.f32 -1.4531521, %v360_v58 }
 0x115   :  { %v654_v55 = vadd.f32 1.0, %v638_v28  ;;  %722 = vst.msk [vmem:[%s1422_s5] sm:$0xff] %vm721_vm8, %v705_v18  ;;  %v713_v61 = vadd.f32 %v1149_v57, %v690_v51  ;;  %v662_v42 = vmul.f32 %v646_v52, %v1048_v35  ;;  %v541_v59 = vmul.f32 1.442695, %v1094_v63 }
 0x116   :  { %v1196_v29 = vmul.f32 0.70710677, %v1087_v44  ;;  %v613_v5 = vsub.f32 0.0, %v581_v37  ;;  %v573_v24 = vmul.f32 %v1124_v32, %v493_v1  ;;  %v392_v9 = vmul.f32 %v1130_v34, %v376_v0 }
 0x117   :  { %v670_v6 = vmul.f32 %v654_v55, %v1054_v39  ;;  %730 = vst.msk [vmem:[%s1422_s5 + $0x40] sm:$0xff] %vm721_vm8, %v713_v61  ;;  %v685_v10 = vmul.f32 %v1138_v53, %v662_v42  ;;  %vm597_vm11 = vcmp.lt.f32.partialorder %v1038_v14, 0.0  ;;  %v1209_v63 = vmul.f32 0.70710677, %v1181_v60 }
 0x118   :  { %v288_v35 = vand.u32 2147483647, %v1196_v29  ;;  %v629_v23 = vsel %vm597_vm11, %v613_v5, %v581_v37  ;;  %v589_v32 = vsub.f32 1.0, %v573_v24  ;;  %v408_v12 = vadd.f32 1.4214138, %v392_v9 }
 0x119   :  { %v693_v39 = vmul.f32 %v1138_v53, %v670_v6  ;;  %v708_v20 = vadd.f32 %v1149_v57, %v685_v10  ;;  %v645_v48 = vadd.f32 1.0, %v629_v23  ;;  %851 = vpow2.f32 %v541_v59 }
 0x11a   :  { %v304_v27 = vmul.f32 0.3275911, %v288_v35  ;;  %v621_v17 = vsub.f32 0.0, %v589_v32  ;;  %v424_v14 = vmul.f32 %v1130_v34, %v408_v12  ;;  %v279_v22 = vand.u32 2147483647, %v1209_v63 }
 0x11b   :  { %v716_v21 = vadd.f32 %v1149_v57, %v693_v39  ;;  %725 = vst.msk [vmem:[%s1422_s5 + $0x18] sm:$0xff] %vm721_vm8, %v708_v20  ;;  %v661_v16 = vmul.f32 %v645_v48, %v1072_v15  ;;  %vm605_vm12 = vcmp.lt.f32.partialorder %v1044_v25, 0.0  ;;  %v253_v36 = vmul.f32 0.5, %v1034_v11 }
 0x11c   :  { %v320_v26 = vadd.f32 1.0, %v304_v27  ;;  %v637_v33 = vsel %vm605_vm12, %v621_v17, %v589_v32  ;;  %v440_v50 = vadd.f32 -0.28449672, %v424_v14  ;;  %v295_v30 = vmul.f32 0.3275911, %v279_v22 }
 0x11d   :  { %733 = vst.msk [vmem:[%s1422_s5 + $0x58] sm:$0xff] %vm721_vm8, %v716_v21  ;;  %v684_v49 = vmul.f32 %v1138_v53, %v661_v16  ;;  %v653_v13 = vadd.f32 1.0, %v637_v33  ;;  %v1231_v25 = vadd.f32 %v985_v19, %v1015_v62  ;;  %v1236_v31 = vadd.f32 %v1022_v3, %v985_v19 }
 0x11e   :  { %853 = vrcp.f32 %v320_v26  ;;  %v456_v38 = vmul.f32 %v1130_v34, %v440_v50  ;;  %v311_v15 = vadd.f32 1.0, %v295_v30  ;;  %v1252_v3 = vadd.f32 %v1024_v4, %v985_v19 }
 0x11f   :  { %v707_v40 = vadd.f32 %v1149_v57, %v684_v49  ;;  %v669_v2 = vmul.f32 %v653_v13, %v253_v36  ;;  %v1244_v43 = vmul.f32 0.70710677, %v1231_v25  ;;  %v1247_v62 = vmul.f32 0.70710677, %v1236_v31 }
 0x120   :  { %v472_v41 = vadd.f32 0.2548296, %v456_v38  ;;  %855 = vrcp.f32 %v311_v15  ;;  %v512_v45 = vsub.f32 0.0, %v288_v35  ;;  %v1260_v28 = vmul.f32 0.70710677, %v1252_v3 }
 0x121   :  { %724 = vst.msk [vmem:[%s1422_s5 + $0x10] sm:$0xff] %vm721_vm8, %v707_v40  ;;  %v692_v11 = vmul.f32 %v1138_v53, %v669_v2  ;;  %v287_v18 = vand.u32 2147483647, %v1244_v43  ;;  %v1257_v51 = vand.u32 2147483647, %v1247_v62  ;;  %v503_v4 = vsub.f32 0.0, %v279_v22 }
 0x122   :  { %v488_v58 = vmul.f32 %v1130_v34, %v472_v41  ;;  %v1269_v37 = vadd.f32 %v985_v19, %v1028_v7  ;;  %v1272_v0 = vand.u32 2147483647, %v1260_v28  ;;  %v528_v42 = vmul.f32 %v512_v45, %v288_v35 }
 0x123   :  { %v852_v54 = vpop.eup %851  ;;  %v715_v46 = vadd.f32 %v1149_v57, %v692_v11  ;;  %v303_v34 = vmul.f32 0.3275911, %v287_v18  ;;  %v298_v55 = vmul.f32 0.3275911, %v1257_v51  ;;  %vm600_vm13 = vcmp.lt.f32.partialorder %v1068_v56, 0.0 }
 0x124   :  { %v568_v52 = vmul.f32 %v852_v54, %v488_v58  ;;  %v306_v9 = vmul.f32 0.3275911, %v1272_v0  ;;  %v519_v10 = vmul.f32 %v503_v4, %v279_v22  ;;  %v1280_v7 = vmul.f32 0.70710677, %v1269_v37 }
 0x125   :  { %732 = vst.msk [vmem:[%s1422_s5 + $0x50] sm:$0xff] %vm721_vm8, %v715_v46  ;;  %v319_v59 = vadd.f32 1.0, %v303_v34  ;;  %v314_v6 = vadd.f32 1.0, %v298_v55  ;;  %v248_v12 = vmul.f32 0.5, %v1058_v47  ;;  %v557_v48 = vmul.f32 1.442695, %v528_v42 }
 0x126   :  { %v584_v1 = vsub.f32 1.0, %v568_v52  ;;  %v322_v35 = vadd.f32 1.0, %v306_v9  ;;  %v281_v56 = vand.u32 2147483647, %v1280_v7  ;;  %v539_v22 = vmul.f32 1.442695, %v519_v10 }
 0x127   :  { %857 = vrcp.f32 %v319_v59  ;;  %v511_v26 = vsub.f32 0.0, %v287_v18  ;;  %v1290_v50 = vadd.f32 %v985_v19, %v1030_v8  ;;  %v506_v36 = vsub.f32 0.0, %v1257_v51 }
 0x128   :  { %v1274_v61 = vpop.eup %853  ;;  %v616_v5 = vsub.f32 0.0, %v584_v1  ;;  %859 = vrcp.f32 %v314_v6  ;;  %v297_v33 = vmul.f32 0.3275911, %v281_v56  ;;  %v1301_v19 = vmul.f32 0.5, %v1087_v44 }
 0x129   :  { %v368_v24 = vmul.f32 1.0614054, %v1274_v61  ;;  %861 = vrcp.f32 %v322_v35  ;;  %v1298_v40 = vmul.f32 0.70710677, %v1290_v50  ;;  %v527_v2 = vmul.f32 %v511_v26, %v287_v18 }
 0x12a   :  { %v1282_v39 = vpop.eup %855  ;;  %v632_v23 = vsel %vm600_vm13, %v616_v5, %v584_v1  ;;  %863 = vpow2.f32 %v557_v48  ;;  %v313_v13 = vadd.f32 1.0, %v297_v33  ;;  %v1310_v11 = vmul.f32 0.5, %v1181_v60 }
 0x12b   :  { %v384_v32 = vadd.f32 -1.4531521, %v368_v24  ;;  %v648_v20 = vadd.f32 1.0, %v632_v23  ;;  %v359_v27 = vmul.f32 1.0614054, %v1282_v39  ;;  %865 = vpow2.f32 %v539_v22 }
 0x12c   :  { %867 = vrcp.f32 %v313_v13  ;;  %v514_v54 = vsub.f32 0.0, %v1272_v0  ;;  %v1315_v44 = vand.u32 2147483647, %v1298_v40  ;;  %v522_v52 = vmul.f32 %v506_v36, %v1257_v51 }
 0x12d   :  { %v400_v21 = vmul.f32 %v1274_v61, %v384_v32  ;;  %v664_v17 = vmul.f32 %v648_v20, %v248_v12  ;;  %v375_v14 = vadd.f32 -1.4531521, %v359_v27  ;;  %v505_v4 = vsub.f32 0.0, %v281_v56 }
 0x12e   :  { %v305_v55 = vmul.f32 0.3275911, %v1315_v44  ;;  %v555_v59 = vmul.f32 1.442695, %v527_v2  ;;  %v530_v9 = vmul.f32 %v514_v54, %v1272_v0  ;;  %v545_v32 = vmul.f32 1.442695, %v522_v52 }
 0x12f   :  { %v416_v16 = vadd.f32 1.4214138, %v400_v21  ;;  %v687_v47 = vmul.f32 %v1138_v53, %v664_v17  ;;  %v391_v30 = vmul.f32 %v1282_v39, %v375_v14  ;;  %v521_v27 = vmul.f32 %v505_v4, %v281_v56 }
 0x130   :  { %v321_v10 = vadd.f32 1.0, %v305_v55  ;;  %vm608_vm14 = vcmp.lt.f32.partialorder %v1196_v29, 0.0  ;;  %vm599_vm15 = vcmp.lt.f32.partialorder %v1209_v63, 0.0  ;;  %vm607_vm0 = vcmp.lt.f32.partialorder %v1244_v43, 0.0 }
 0x131   :  { %v432_v49 = vmul.f32 %v1274_v61, %v416_v16  ;;  %v710_v38 = vadd.f32 %v1149_v57, %v687_v47  ;;  %v407_v15 = vadd.f32 1.4214138, %v391_v30  ;;  %v1303_v41 = vpop.eup %857  ;;  %v561_v16 = vmul.f32 1.442695, %v530_v9 }
 0x132   :  { %v1317_v46 = vpop.eup %859  ;;  %v367_v18 = vmul.f32 1.0614054, %v1303_v41  ;;  %869 = vrcp.f32 %v321_v10  ;;  %v543_v13 = vmul.f32 1.442695, %v521_v27  ;;  %vm602_vm1 = vcmp.lt.f32.partialorder %v1247_v62, 0.0 }
 0x133   :  { %v448_v8 = vadd.f32 -0.28449672, %v432_v49  ;;  %727 = vst.msk [vmem:[%s1422_s5 + $0x28] sm:$0xff] %vm721_vm8, %v710_v38  ;;  %v423_v58 = vmul.f32 %v1282_v39, %v407_v15  ;;  %v362_v60 = vmul.f32 1.0614054, %v1317_v46  ;;  %v1324_v6 = vpop.eup %861  ;;  %871 = vpow2.f32 %v555_v59 }
 0x134   :  { %v383_v42 = vadd.f32 -1.4531521, %v367_v18  ;;  %v370_v35 = vmul.f32 1.0614054, %v1324_v6  ;;  %v864_v12 = vpop.eup %863  ;;  %873 = vpow2.f32 %v545_v32  ;;  %vm610_vm2 = vcmp.lt.f32.partialorder %v1260_v28, 0.0 }
 0x135   :  { %v464_v45 = vmul.f32 %v1274_v61, %v448_v8  ;;  %v439_v34 = vadd.f32 -0.28449672, %v423_v58  ;;  %v378_v24 = vadd.f32 -1.4531521, %v362_v60  ;;  %v866_v0 = vpop.eup %865  ;;  %v513_v8 = vsub.f32 0.0, %v1315_v44 }
 0x136   :  { %v399_v51 = vmul.f32 %v1303_v41, %v383_v42  ;;  %v386_v14 = vadd.f32 -1.4531521, %v370_v35  ;;  %v1334_v26 = vpop.eup %867  ;;  %875 = vpow2.f32 %v561_v16  ;;  %vm601_vm3 = vcmp.lt.f32.partialorder %v1280_v7, 0.0 }
 0x137   :  { %v480_v1 = vadd.f32 0.2548296, %v464_v45  ;;  %v455_v5 = vmul.f32 %v1282_v39, %v439_v34  ;;  %v394_v48 = vmul.f32 %v1317_v46, %v378_v24  ;;  %v361_v36 = vmul.f32 1.0614054, %v1334_v26 }
 0x138   :  { %v415_v17 = vadd.f32 1.4214138, %v399_v51  ;;  %v402_v56 = vmul.f32 %v1324_v6, %v386_v14  ;;  %877 = vpow2.f32 %v543_v13  ;;  %v529_v59 = vmul.f32 %v513_v8, %v1315_v44 }
 0x139   :  { %v496_v23 = vmul.f32 %v1274_v61, %v480_v1  ;;  %v471_v20 = vadd.f32 0.2548296, %v455_v5  ;;  %v410_v61 = vadd.f32 1.4214138, %v394_v48  ;;  %v377_v54 = vadd.f32 -1.4531521, %v361_v36 }
 0x13a   :  { %v431_v47 = vmul.f32 %v1303_v41, %v415_v17  ;;  %vm609_vm4 = vcmp.lt.f32.partialorder %v1298_v40, 0.0 }
 0x13b   :  { %v576_v21 = vmul.f32 %v864_v12, %v496_v23  ;;  %v487_v22 = vmul.f32 %v1282_v39, %v471_v20  ;;  %v426_v49 = vmul.f32 %v1317_v46, %v410_v61  ;;  %v418_v39 = vadd.f32 1.4214138, %v402_v56 }
 0x13c   :  { %v447_v15 = vadd.f32 -0.28449672, %v431_v47  ;;  %v393_v55 = vmul.f32 %v1334_v26, %v377_v54  ;;  %v1349_v5 = vpop.eup %869 }
 0x13d   :  { %v592_v33 = vsub.f32 1.0, %v576_v21  ;;  %v567_v30 = vmul.f32 %v866_v0, %v487_v22  ;;  %v442_v58 = vadd.f32 -0.28449672, %v426_v49  ;;  %v434_v52 = vmul.f32 %v1324_v6, %v418_v39  ;;  %v872_v35 = vpop.eup %871 }
 0x13e   :  { %v463_v18 = vmul.f32 %v1303_v41, %v447_v15  ;;  %v409_v9 = vadd.f32 1.4214138, %v393_v55  ;;  %v369_v32 = vmul.f32 1.0614054, %v1349_v5  ;;  %v874_v48 = vpop.eup %873  ;;  %v559_v22 = vmul.f32 1.442695, %v529_v59 }
 0x13f   :  { %v624_v38 = vsub.f32 0.0, %v592_v33  ;;  %v583_v2 = vsub.f32 1.0, %v567_v30  ;;  %v458_v60 = vmul.f32 %v1317_v46, %v442_v58  ;;  %v450_v42 = vadd.f32 -0.28449672, %v434_v52 }
 0x140   :  { %v479_v1 = vadd.f32 0.2548296, %v463_v18  ;;  %v425_v44 = vmul.f32 %v1334_v26, %v409_v9  ;;  %v385_v17 = vadd.f32 -1.4531521, %v369_v32  ;;  %v876_v47 = vpop.eup %875  ;;  %879 = vpow2.f32 %v559_v22 }
 0x141   :  { %v640_v45 = vsel %vm608_vm14, %v624_v38, %v592_v33  ;;  %v615_v34 = vsub.f32 0.0, %v583_v2  ;;  %v474_v24 = vadd.f32 0.2548296, %v458_v60  ;;  %v466_v51 = vmul.f32 %v1324_v6, %v450_v42 }
 0x142   :  { %v656_v4 = vadd.f32 1.0, %v640_v45  ;;  %v495_v23 = vmul.f32 %v1303_v41, %v479_v1  ;;  %v441_v0 = vadd.f32 -0.28449672, %v425_v44  ;;  %v878_v15 = vpop.eup %877  ;;  %v255_v58 = vmul.f32 0.5, %v1231_v25 }
 0x143   :  { %v631_v63 = vsel %vm599_vm15, %v615_v34, %v583_v2  ;;  %v490_v20 = vmul.f32 %v1317_v46, %v474_v24  ;;  %v482_v21 = vadd.f32 0.2548296, %v466_v51  ;;  %v401_v46 = vmul.f32 %v1349_v5, %v385_v17 }
 0x144   :  { %v672_v29 = vmul.f32 %v656_v4, %v1301_v19  ;;  %v647_v10 = vadd.f32 1.0, %v631_v63  ;;  %v575_v27 = vmul.f32 %v872_v35, %v495_v23  ;;  %v457_v56 = vmul.f32 %v1334_v26, %v441_v0 }
 0x145   :  { %v570_v41 = vmul.f32 %v874_v48, %v490_v20  ;;  %v498_v33 = vmul.f32 %v1324_v6, %v482_v21  ;;  %v417_v13 = vadd.f32 1.4214138, %v401_v46  ;;  %v250_v18 = vmul.f32 0.5, %v1236_v31 }
 0x146   :  { %v695_v12 = vmul.f32 %v1138_v53, %v672_v29  ;;  %v663_v19 = vmul.f32 %v647_v10, %v1310_v11  ;;  %v591_v16 = vsub.f32 1.0, %v575_v27  ;;  %v473_v6 = vadd.f32 0.2548296, %v457_v56 }
 0x147   :  { %v586_v11 = vsub.f32 1.0, %v570_v41  ;;  %v578_v36 = vmul.f32 %v876_v47, %v498_v33  ;;  %v433_v2 = vmul.f32 %v1349_v5, %v417_v13  ;;  %v258_v25 = vmul.f32 0.5, %v1252_v3 }
 0x148   :  { %v718_v14 = vadd.f32 %v1149_v57, %v695_v12  ;;  %v686_v61 = vmul.f32 %v1138_v53, %v663_v19  ;;  %v623_v49 = vsub.f32 0.0, %v591_v16  ;;  %v489_v43 = vmul.f32 %v1334_v26, %v473_v6 }
 0x149   :  { %v618_v38 = vsub.f32 0.0, %v586_v11  ;;  %v594_v8 = vsub.f32 1.0, %v578_v36  ;;  %v449_v34 = vadd.f32 -0.28449672, %v433_v2  ;;  %v249_v35 = vmul.f32 0.5, %v1269_v37 }
 0x14a   :  { %735 = vst.msk [vmem:[%s1422_s5 + $0x68] sm:$0xff] %vm721_vm8, %v718_v14  ;;  %v709_v30 = vadd.f32 %v1149_v57, %v686_v61  ;;  %v639_v39 = vsel %vm607_vm0, %v623_v49, %v591_v16  ;;  %v569_v55 = vmul.f32 %v878_v15, %v489_v43  ;;  %v880_v51 = vpop.eup %879  ;;  %v257_v37 = vmul.f32 0.5, %v1290_v50 }
 0x14b   :  { %v655_v54 = vadd.f32 1.0, %v639_v39  ;;  %v634_v45 = vsel %vm602_vm1, %v618_v38, %v586_v11  ;;  %v626_v4 = vsub.f32 0.0, %v594_v8  ;;  %v465_v42 = vmul.f32 %v1349_v5, %v449_v34 }
 0x14c   :  { %726 = vst.msk [vmem:[%s1422_s5 + $0x20] sm:$0xff] %vm721_vm8, %v709_v30  ;;  %v650_v52 = vadd.f32 1.0, %v634_v45  ;;  %v585_v63 = vsub.f32 1.0, %v569_v55 }
 0x14d   :  { %v671_v60 = vmul.f32 %v655_v54, %v255_v58  ;;  %v642_v62 = vsel %vm610_vm2, %v626_v4, %v594_v8  ;;  %v481_v31 = vadd.f32 0.2548296, %v465_v42 }
 0x14e   :  { %v666_v1 = vmul.f32 %v650_v52, %v250_v18  ;;  %v658_v29 = vadd.f32 1.0, %v642_v62  ;;  %v617_v10 = vsub.f32 0.0, %v585_v63 }
 0x14f   :  { %v694_v59 = vmul.f32 %v1138_v53, %v671_v60  ;;  %v497_v23 = vmul.f32 %v1349_v5, %v481_v31 }
 0x150   :  { %v689_v26 = vmul.f32 %v1138_v53, %v666_v1  ;;  %v674_v9 = vmul.f32 %v658_v29, %v258_v25  ;;  %v633_v32 = vsel %vm601_vm3, %v617_v10, %v585_v63 }
 0x151   :  { %v717_v24 = vadd.f32 %v1149_v57, %v694_v59  ;;  %v649_v12 = vadd.f32 1.0, %v633_v32  ;;  %v577_v7 = vmul.f32 %v880_v51, %v497_v23 }
 0x152   :  { %v712_v28 = vadd.f32 %v1149_v57, %v689_v26  ;;  %v697_v3 = vmul.f32 %v1138_v53, %v674_v9 }
 0x153   :  { %734 = vst.msk [vmem:[%s1422_s5 + $0x60] sm:$0xff] %vm721_vm8, %v717_v24  ;;  %v665_v20 = vmul.f32 %v649_v12, %v249_v35  ;;  %v593_v44 = vsub.f32 1.0, %v577_v7 }
 0x154   :  { %729 = vst.msk [vmem:[%s1422_s5 + $0x38] sm:$0xff] %vm721_vm8, %v712_v28  ;;  %v720_v5 = vadd.f32 %v1149_v57, %v697_v3 }
 0x155   :  { %v688_v48 = vmul.f32 %v1138_v53, %v665_v20  ;;  %v625_v19 = vsub.f32 0.0, %v593_v44 }
 0x156   :  { %737 = vst.msk [vmem:[%s1422_s5 + $0x78] sm:$0xff] %vm721_vm8, %v720_v5 }
 0x157   :  { %v711_v27 = vadd.f32 %v1149_v57, %v688_v48  ;;  %v641_v21 = vsel %vm609_vm4, %v625_v19, %v593_v44 }
 0x158   :  { %v657_v17 = vadd.f32 1.0, %v641_v21 }
 0x159   :  { %728 = vst.msk [vmem:[%s1422_s5 + $0x30] sm:$0xff] %vm721_vm8, %v711_v27 }
 0x15a   :  { %v673_v14 = vmul.f32 %v657_v17, %v257_v37 }
 0x15c   :  { %v696_v41 = vmul.f32 %v1138_v53, %v673_v14 }
 0x15e   :  { %v719_v0 = vadd.f32 %v1149_v57, %v696_v41 }
 0x160   :  { %736 = vst.msk [vmem:[%s1422_s5 + $0x70] sm:$0xff] %vm721_vm8, %v719_v0 }

</bundles_post_ra>
